<compile_context>
chip_gen: v5e
topology: v5e:2x2
jax: 0.10.0
libtpu: 0.0.40
codegen_flags: <defaults>
</compile_context>

<pallas_src>
import jax
import jax.numpy as jnp
from jax.experimental import pallas as pl
from jax.experimental.pallas import tpu as pltpu

EPS = 1e-5
NEG_SLOPE = 0.2


def _round_up(a, b):
    return (a + b - 1) // b * b


def _leaky_relu(v):
    return jnp.where(v > 0, v, NEG_SLOPE * v)


# --------------------------------------------------------------------------- #
# Kernel: y = lrelu(x @ W1' + b1'); y = lrelu(y @ W2' + b2'); out = x + y
# --------------------------------------------------------------------------- #
def linear_block_kernel(x_ref, w1_ref, w2_ref, bias_ref, out_ref):
    x = x_ref[...]                                                   # (TM, Fp)

    y = jnp.dot(x, w1_ref[...], preferred_element_type=jnp.float32)
    y = y + bias_ref[0:1, :]
    y = _leaky_relu(y)
    # dropout = identity (eval mode)

    y = jnp.dot(y.astype(w2_ref.dtype), w2_ref[...],
                preferred_element_type=jnp.float32)
    y = y + bias_ref[1:2, :]
    y = _leaky_relu(y)
    # dropout = identity (eval mode)

    out_ref[...] = x.astype(jnp.float32) + y


# --------------------------------------------------------------------------- #
# Parameter folding / padding (hoisted out of the per-forward path)
# --------------------------------------------------------------------------- #
def fold_bn_params(params):
    """Fold eval-mode BatchNorm + linear bias into weights (exact in f32)."""
    s1 = params["g1"] * jax.lax.rsqrt(params["var1"] + EPS)          # (1, F)
    s2 = params["g2"] * jax.lax.rsqrt(params["var2"] + EPS)
    w1f = params["w1_t"] * s1                                        # scale output cols
    w2f = params["w2_t"] * s2
    b1f = (params["b1"] - params["mean1"]) * s1 + params["beta1"]
    b2f = (params["b2"] - params["mean2"]) * s2 + params["beta2"]
    return w1f, w2f, b1f, b2f


def prepare_folded_params(params, compute_dtype=jnp.float32):
    """Run once per parameter set: fold BN, pad to lane-dense Fp, pack biases."""
    w1f, w2f, b1f, b2f = fold_bn_params(params)                      # f32 fold
    F = w1f.shape[0]
    Fp = _round_up(F, 128)

    w1p = jnp.pad(w1f, ((0, Fp - F), (0, Fp - F))).astype(compute_dtype)
    w2p = jnp.pad(w2f, ((0, Fp - F), (0, Fp - F))).astype(compute_dtype)

    # Pack both folded biases into one (8, Fp) f32 operand: row 0 -> b1', row 1 -> b2'.
    bias = jnp.zeros((8, Fp), jnp.float32)
    bias = bias.at[0, :F].set(b1f[0])
    bias = bias.at[1, :F].set(b2f[0])

    return {"w1p": w1p, "w2p": w2p, "bias": bias, "F": F, "Fp": Fp,
            "compute_dtype": compute_dtype}


def _pick_vmem_limit(needed_bytes):
    """Explicit scoped-VMEM limit: need + margin, capped ~8 MiB below physical."""
    phys = 64 << 20                       # conservative default (v7x per-core)
    try:
        phys = pltpu.get_tpu_info().vmem_capacity_bytes
    except Exception:
        pass
    return int(min(max(needed_bytes + (4 << 20), 32 << 20), phys - (8 << 20)))


# --------------------------------------------------------------------------- #
# Forward wrapper
# --------------------------------------------------------------------------- #
def linear_block(x, prepared, *, tm_max=512):
    """x: (N, F) float32; prepared: dict from prepare_folded_params."""
    N, F = x.shape
    assert F == prepared["F"]
    Fp = prepared["Fp"]
    w1p, w2p, bias = prepared["w1p"], prepared["w2p"], prepared["bias"]
    compute_dtype = prepared["compute_dtype"]

    # Balanced batch tiles; guarantee >= 2 grid steps when N >= 16 so the
    # "parallel" batch axis can shard across both v7x TensorCores.
    n_steps = pl.cdiv(N, tm_max)
    if N >= 16:
        n_steps = max(n_steps, 2)
    tm = _round_up(pl.cdiv(N, n_steps), 8)
    Np = tm * n_steps

    xp = jnp.pad(x, ((0, Np - N), (0, Fp - F))).astype(compute_dtype)

    itemsize = jnp.dtype(compute_dtype).itemsize
    # Weights single-buffered + bias + x/out tiles double-buffered.
    vmem_needed = (2 * Fp * Fp * itemsize + 8 * Fp * 4
                   + 2 * tm * Fp * itemsize + 2 * tm * Fp * 4)
    vmem_limit = _pick_vmem_limit(vmem_needed)

    cost = pl.CostEstimate(
        flops=4 * Np * Fp * Fp,
        transcendentals=0,
        bytes_accessed=2 * Np * Fp * 4 + 2 * Fp * Fp * itemsize + 8 * Fp * 4,
    )

    out = pl.pallas_call(
        linear_block_kernel,
        out_shape=jax.ShapeDtypeStruct((Np, Fp), jnp.float32),
        grid=(n_steps,),
        in_specs=[
            pl.BlockSpec((tm, Fp), lambda i: (i, 0)),    # x tile (pipelined over batch)
            pl.BlockSpec((Fp, Fp), lambda i: (0, 0),     # W1' resident, single-buffered
                         pipeline_mode=pl.Buffered(buffer_count=1)),
            pl.BlockSpec((Fp, Fp), lambda i: (0, 0),     # W2' resident, single-buffered
                         pipeline_mode=pl.Buffered(buffer_count=1)),
            pl.BlockSpec((8, Fp), lambda i: (0, 0),      # packed biases, single-buffered
                         pipeline_mode=pl.Buffered(buffer_count=1)),
        ],
        out_specs=pl.BlockSpec((tm, Fp), lambda i: (i, 0)),
        compiler_params=pltpu.CompilerParams(
            dimension_semantics=("parallel",),           # megacore sharding on v7x
            vmem_limit_bytes=vmem_limit,
        ),
        cost_estimate=cost,
    )(xp, w1p, w2p, bias)

    return out[:N, :F]


# --------------------------------------------------------------------------- #
# Deterministic synthetic parameters + pure-JAX reference
# --------------------------------------------------------------------------- #
def init_params(key, linear_size):
    """Synthetic parameters matching nn.Linear / nn.BatchNorm1d shapes."""
    F = linear_size
    ks = jax.random.split(key, 12)
    scale = 1.0 / jnp.sqrt(F)

    # nn.Linear: weight (F_out, F_in), bias (F,). Pre-transposed -> (F_in, F_out).
    w1 = jax.random.uniform(ks[0], (F, F), jnp.float32, -scale, scale)
    b1 = jax.random.uniform(ks[1], (1, F), jnp.float32, -scale, scale)
    w2 = jax.random.uniform(ks[2], (F, F), jnp.float32, -scale, scale)
    b2 = jax.random.uniform(ks[3], (1, F), jnp.float32, -scale, scale)

    g1 = 1.0 + 0.1 * jax.random.normal(ks[4], (1, F), jnp.float32)
    beta1 = 0.1 * jax.random.normal(ks[5], (1, F), jnp.float32)
    mean1 = 0.1 * jax.random.normal(ks[6], (1, F), jnp.float32)
    var1 = jnp.abs(1.0 + 0.1 * jax.random.normal(ks[7], (1, F), jnp.float32))

    g2 = 1.0 + 0.1 * jax.random.normal(ks[8], (1, F), jnp.float32)
    beta2 = 0.1 * jax.random.normal(ks[9], (1, F), jnp.float32)
    mean2 = 0.1 * jax.random.normal(ks[10], (1, F), jnp.float32)
    var2 = jnp.abs(1.0 + 0.1 * jax.random.normal(ks[11], (1, F), jnp.float32))

    return {
        "w1_t": w1.T, "b1": b1, "g1": g1, "beta1": beta1, "mean1": mean1, "var1": var1,
        "w2_t": w2.T, "b2": b2, "g2": g2, "beta2": beta2, "mean2": mean2, "var2": var2,
    }


def reference(x, p):
    """Pure-JAX reference of the original (unfolded) eval-mode forward."""
    y = x @ p["w1_t"] + p["b1"]
    y = (y - p["mean1"]) / jnp.sqrt(p["var1"] + EPS) * p["g1"] + p["beta1"]
    y = jnp.where(y > 0, y, NEG_SLOPE * y)
    y = y @ p["w2_t"] + p["b2"]
    y = (y - p["mean2"]) / jnp.sqrt(p["var2"] + EPS) * p["g2"] + p["beta2"]
    y = jnp.where(y > 0, y, NEG_SLOPE * y)
    return x + y


if __name__ == "__main__":
    batch = 16
    linear_size = 128

    key = jax.random.PRNGKey(0)
    kx, kp = jax.random.split(key)
    x = jax.random.normal(kx, (batch, linear_size), jnp.float32)
    params = init_params(kp, linear_size)

    # Fold / pad / pack once (hoisted out of the per-forward path).
    prepared = prepare_folded_params(params, compute_dtype=jnp.float32)

    out = jax.block_until_ready(linear_block(x, prepared))
    ref = reference(x, params)

    assert out.shape == (batch, linear_size)
    assert jnp.allclose(out, ref, atol=1e-4, rtol=1e-4), "mismatch vs reference"

    print("KERNEL_OK")
</pallas_src>

<mosaic_0001>
module attributes {stable_mosaic.version = 11 : i64} {
  func.func @linear_block_kernel(%arg0: i32, %arg1: memref<8x128xf32, #tpu.memory_space<vmem>>, %arg2: memref<128x128xf32, #tpu.memory_space<vmem>>, %arg3: memref<128x128xf32, #tpu.memory_space<vmem>>, %arg4: memref<8x128xf32, #tpu.memory_space<vmem>>, %arg5: memref<8x128xf32, #tpu.memory_space<vmem>>) attributes {dimension_semantics = [#tpu.dimension_semantics<parallel>], iteration_bounds = array<i64: 2>, scalar_prefetch = 0 : i64, scratch_operands = 0 : i64, tpu.core_type = #tpu.core_type<tc>, window_params = [{transform_indices = @transform_0, window_bounds = array<i64: 8, 128>}, {pipeline_mode = #tpu.pipeline_mode<synchronous>, transform_indices = @transform_1, window_bounds = array<i64: 128, 128>}, {pipeline_mode = #tpu.pipeline_mode<synchronous>, transform_indices = @transform_2, window_bounds = array<i64: 128, 128>}, {pipeline_mode = #tpu.pipeline_mode<synchronous>, transform_indices = @transform_3, window_bounds = array<i64: 8, 128>}, {transform_indices = @transform_4, window_bounds = array<i64: 8, 128>}]} {
    %c0 = arith.constant 0 : index
    %c0_0 = arith.constant 0 : index
    %0 = vector.load %arg1[%c0, %c0_0] : memref<8x128xf32, #tpu.memory_space<vmem>>, vector<8x128xf32>
    %c0_1 = arith.constant 0 : index
    %c0_2 = arith.constant 0 : index
    %1 = vector.load %arg2[%c0_1, %c0_2] : memref<128x128xf32, #tpu.memory_space<vmem>>, vector<128x128xf32>
    %cst = arith.constant dense<0.000000e+00> : vector<8x128xf32>
    %2 = tpu.matmul %0, %1, %cst {dimension_numbers = #tpu.dot_dimension_numbers<[1], [0], [0], [1], [0, 0, 1, 1], [], []>} : vector<8x128xf32>, vector<128x128xf32>, vector<8x128xf32> -> vector<8x128xf32>
    %c0_3 = arith.constant 0 : index
    %c0_4 = arith.constant 0 : index
    %3 = vector.load %arg4[%c0_3, %c0_4] : memref<8x128xf32, #tpu.memory_space<vmem>>, vector<1x128xf32>
    %4 = vector.broadcast %3 : vector<1x128xf32> to vector<8x128xf32>
    %5 = arith.addf %2, %4 : vector<8x128xf32>
    %cst_5 = arith.constant 0.000000e+00 : f32
    %6 = vector.broadcast %cst_5 : f32 to vector<8x128xf32>
    %7 = arith.cmpf ogt, %5, %6 : vector<8x128xf32>
    %cst_6 = arith.constant 2.000000e-01 : f32
    %8 = vector.broadcast %cst_6 : f32 to vector<8x128xf32>
    %9 = arith.mulf %8, %5 : vector<8x128xf32>
    %10 = arith.select %7, %5, %9 : vector<8x128xi1>, vector<8x128xf32>
    %c0_7 = arith.constant 0 : index
    %c0_8 = arith.constant 0 : index
    %11 = vector.load %arg3[%c0_7, %c0_8] : memref<128x128xf32, #tpu.memory_space<vmem>>, vector<128x128xf32>
    %cst_9 = arith.constant dense<0.000000e+00> : vector<8x128xf32>
    %12 = tpu.matmul %10, %11, %cst_9 {dimension_numbers = #tpu.dot_dimension_numbers<[1], [0], [0], [1], [0, 0, 1, 1], [], []>} : vector<8x128xf32>, vector<128x128xf32>, vector<8x128xf32> -> vector<8x128xf32>
    %c1 = arith.constant 1 : index
    %c0_10 = arith.constant 0 : index
    %13 = vector.load %arg4[%c1, %c0_10] : memref<8x128xf32, #tpu.memory_space<vmem>>, vector<1x128xf32>
    %14 = vector.broadcast %13 : vector<1x128xf32> to vector<8x128xf32>
    %15 = arith.addf %12, %14 : vector<8x128xf32>
    %cst_11 = arith.constant 0.000000e+00 : f32
    %16 = vector.broadcast %cst_11 : f32 to vector<8x128xf32>
    %17 = arith.cmpf ogt, %15, %16 : vector<8x128xf32>
    %cst_12 = arith.constant 2.000000e-01 : f32
    %18 = vector.broadcast %cst_12 : f32 to vector<8x128xf32>
    %19 = arith.mulf %18, %15 : vector<8x128xf32>
    %20 = arith.select %17, %15, %19 : vector<8x128xi1>, vector<8x128xf32>
    %21 = arith.addf %0, %20 : vector<8x128xf32>
    %c0_13 = arith.constant 0 : index
    %c0_14 = arith.constant 0 : index
    %22 = vector.load %arg5[%c0_13, %c0_14] : memref<8x128xf32, #tpu.memory_space<vmem>>, vector<8x128xf32>
    tpu.vector_store %arg5[%c0_13, %c0_14], %21 {strides = array<i32>} : memref<8x128xf32, #tpu.memory_space<vmem>>, vector<8x128xf32>,
    return
  }
  func.func @transform_0(%arg0: i32) -> (i32, i32) {
    %c0_i32 = arith.constant 0 : i32
    %c0_i32_0 = arith.constant 0 : i32
    return %arg0, %c0_i32 : i32, i32
  }
  func.func @transform_1(%arg0: i32) -> (i32, i32) {
    %c0_i32 = arith.constant 0 : i32
    %c0_i32_0 = arith.constant 0 : i32
    %c0_i32_1 = arith.constant 0 : i32
    return %c0_i32, %c0_i32_0 : i32, i32
  }
  func.func @transform_2(%arg0: i32) -> (i32, i32) {
    %c0_i32 = arith.constant 0 : i32
    %c0_i32_0 = arith.constant 0 : i32
    %c0_i32_1 = arith.constant 0 : i32
    return %c0_i32, %c0_i32_0 : i32, i32
  }
  func.func @transform_3(%arg0: i32) -> (i32, i32) {
    %c0_i32 = arith.constant 0 : i32
    %c0_i32_0 = arith.constant 0 : i32
    %c0_i32_1 = arith.constant 0 : i32
    return %c0_i32, %c0_i32_0 : i32, i32
  }
  func.func @transform_4(%arg0: i32) -> (i32, i32) {
    %c0_i32 = arith.constant 0 : i32
    %c0_i32_0 = arith.constant 0 : i32
    return %arg0, %c0_i32 : i32, i32
  }
}

</mosaic_0001>

<bundles_post_ra>
// kernel: tpu_custom_call.1
= control target key start
LH: loop header
LB: loop body
LE: loop exit
PB: predicated region body
PF: predicated region fallthrough
CT: control target
= control target key end

     0   :  { %9 = vsyncpa [#allocation3], 0  ;;  %s951_s0 = inlined_call_operand.hbm [shape: f32[16,128], index: 0, kind: input, shape index: {}]   ;;  %s952_s1 = inlined_call_operand.hbm [shape: f32[128,128], index: 1, kind: input, shape index: {}]   ;;  %s953_s2 = inlined_call_operand.hbm [shape: f32[128,128], index: 2, kind: input, shape index: {}]   ;;  %s954_s3 = inlined_call_operand.hbm [shape: f32[8,128], index: 3, kind: input, shape index: {}]   ;;  %s955_s4 = inlined_call_operand.hbm [shape: f32[16,128], index: 4, kind: output, shape index: {}]  }
   0x1   :  { %11 = vsyncpa [#allocation3 + $0x1], 0 }
   0x2   :  { %12 = vsyncpa [#allocation6], 0 }
   0x3   :  { %13 = vsyncpa [#allocation9], 0 }
   0x4   :  { %14 = vsyncpa [#allocation4], 0 }
   0x5   :  { %16 = vsyncpa [#allocation4 + $0x1], 0  ;;  %s788_s15 = smov 0   ;;  %s790_s16 = smov 0  }
   0x6   :  { %s792_s17 = smov 0   ;;  %s794_s18 = smov 0  }
   0x7 LB: > { %s153_s21 = sshll.u32 %s952_s1, 4  ;;  %s812_s22 = sadd.s32 4294967295, %s756_s18   ;;  %s756_s18 = sphi %s794_s18, %s966_s18   ;;  %s752_s17 = sphi %s792_s17, %s965_s17   ;;  %s748_s16 = sphi %s790_s16, %s964_s16   ;;  %s744_s15 = sphi %s788_s15, %s963_s15   ;;  %s154_s21 = int_to_ptr.hbm [resolvable:$true] %s153_s21 }
   0x8   : > { %p464_p0 = scmp.ge.s32.totalorder %s756_s18, 1  ;;  %p43_p1 = scmp.eq.s32.totalorder %s812_s22, 0 }
   0x9   : > { %p142_p2 = scmp.lt.s32.totalorder %s756_s18, 3  ;;  %s758_s24 = smov [#allocation5]  }
   0xa   : > { %s155_s25 = sshll.u32 %s758_s24, 4  ;;  %s167_s28 = sshll.u32 %s953_s2, 4  ;;  %s156_s25 = int_to_ptr.vmem [resolvable:$true] %s155_s25  ;;  %s168_s28 = int_to_ptr.hbm [resolvable:$true] %s167_s28 }
   0xb   : > { %p817_p3 = pnand %p464_p0, %p142_p2  ;;  %s182_s6 = sshll.u32 %s954_s3, 4  ;;  %s183_s6 = int_to_ptr.hbm [resolvable:$true] %s182_s6 }
   0xc   : > { %s759_s7 = smov [#allocation7]   ;;  %s760_s9 = smov 128  }
   0xd   : > { %p497_p4 = pneg %p817_p3  ;;  %s169_s8 = sshll.u32 %s759_s7, 4  ;;  %s170_s8 = int_to_ptr.vmem [resolvable:$true] %s169_s8 }
   0xe   : > { %s761_s10 = smov 8   ;;  %s762_s11 = smov [#allocation8]  }
   0xf   : > { %p829_p6 = pnand %p497_p4, %p43_p1  ;;  %s184_s12 = sshll.u32 %s762_s11, 4  ;;  %s185_s12 = int_to_ptr.vmem [resolvable:$true] %s184_s12 }
  0x10   : > { %s463_s13 = sadd.s32 4294967294, %s756_s18   ;;  %s844_s14 = sadd.s32 1, %s756_s18  }
  0x11   : > { %500 = dma.hbm_to_vmem [thread:$0]  (!%p829_p6), %s154_s21, 2048, %s156_s25, [#allocation6], %s760_s9, %s760_s9, %s761_s10  }
  0x12   : > { %503 = dma.hbm_to_vmem [thread:$0]  (!%p829_p6), %s168_s28, 2048, %s170_s8, [#allocation6], %s760_s9, %s760_s9, %s761_s10  }
  0x13   : > { %506 = dma.hbm_to_vmem [thread:$0]  (!%p829_p6), %s183_s6, 128, %s185_s12, [#allocation9]  }
  0x14   : > { %s29_s19 = sadd.s32 1, %s752_s17  ;;  %s26_s20 = ssub.s32 %s756_s18, %s844_s14 }
  0x15   : > { %p36_p7 = scmp.ne.s32.totalorder %s752_s17, %s748_s16  ;;  %p27_p8 = scmp.eq.s32.totalorder %s26_s20, 0 }
  0x16   : > { %p37_p9 = scmp.eq.s32.totalorder %s756_s18, 0  ;;  %p42_p10 = scmp.ne.s32.totalorder %s748_s16, %s744_s15 }
  0x17   : > { %p129_p11 = scmp.eq.s32.totalorder %s812_s22, 1  ;;  %p135_p0 = scmp.eq.s32.totalorder %s463_s13, 1 }
  0x18   : > { %s856_s21 = scalar_select %p27_p8, %s752_s17, %s29_s19  }
  0x19   : > { %p860_p12 = por %p43_p1, %p42_p10  ;;  %p864_p13 = por %p129_p11, %p36_p7 }
  0x1a   : > { %p38_p2 = por %p37_p9, %p36_p7  ;;  %s195_s26 = sand.u32 1, %s752_s17  }
  0x1b   : > { %p869_p4 = por %p135_p0, %p42_p10  ;;  %p518_p6 = scmp.lt.s32.totalorder %s756_s18, 2 }
  0x1c   : > { %s469_s28 = sshll.u32 %s195_s26, 3  ;;  %s470_s29 = sshll.u32 %s756_s18, 3 }
  0x1d   : > { %s203_s6 = scalar_lea.hbm %s951_s0, %s470_s29  ;;  %s199_s8 = scalar_lea.vmem [#allocation2], %s469_s28 }
  0x1e   : > { %s205_s7 = sshll.u32 %s203_s6, 4  ;;  %s207_s9 = sshll.u32 %s199_s8, 4  ;;  %s206_s7 = int_to_ptr.hbm [resolvable:$true] %s205_s7  ;;  %s208_s9 = int_to_ptr.vmem [resolvable:$true] %s207_s9 }
  0x1f   : > { %p878_p8 = pnand %p518_p6, %p38_p2  ;;  %s196_s11 = scalar_lea.sflag [#allocation3], %s195_s26 }
  0x20   : > { %s652_s12 = sshra.s32 %s206_s7, 4  ;;  %s659_s28 = scalar_lea.hbm %s951_s0, 16  ;;  %s653_s12 = int_to_ptr.hbm [resolvable:$true] %s652_s12 }
  0x21   : > { %s654_s13 = scalar_lea.hbm %s653_s12, 8  ;;  %p656_p9 = pneg %p878_p8 }
  0x22   : > { %p655_p7 = scmp.ne.s32.totalorder %s653_s12, %s654_s13  ;;  %p660_p0 = scmp.lt.s32.totalorder %s653_s12, %s951_s0 }
  0x23   : > { %p661_p2 = scmp.lt.s32.totalorder %s659_s28, %s654_s13 }
  0x24   : > { %p657_p10 = pnand %p656_p9, %p655_p7 }
  0x25   : > { %p662_p6 = por %p661_p2, %p660_p0 }
  0x26   : > { %p658_p11 = pneg %p657_p10 }
  0x28   : > { %p663_p5 = pnand %p662_p6, %p658_p11 }
  0x2a   : > { %666 = shalt.err (!%p663_p5)
}
  0x2b   : > { %510 = dma.hbm_to_vmem [thread:$0]  (!%p878_p8), %s206_s7, 128, %s208_s9, %s196_s11  }
  0x2c   : > { %216 = sbr.rel (%p817_p3) target bundleno = 353 (0x161), region = 36  ;;  %s895_s26 = sand.u32 (!%p817_p3), 1, %s748_s16  }
  0x2d   : > { %s472_s5 = sshll.u32 (!%p817_p3), %s895_s26, 3  ;;  %s219_s6 = scalar_lea.sflag (!%p817_p3), [#allocation3], %s895_s26 }
  0x2e   : > { %s901_s8 = scalar_lea.vmem (!%p817_p3), [#allocation2], %s472_s5 }
  0x31   : > { %727 = dma.done.wait (%p860_p12), %s219_s6, 128  }
  0x32   : > { %729 = vsyncadd (%p860_p12), %s219_s6, 4294967168 }
  0x33   : > { %731 = dma.done.wait (%p43_p1), [#allocation6], 4096  }
  0x34   : > { %733 = vsyncadd (%p43_p1), [#allocation6], 4294963200 }
  0x35   : > { %735 = dma.done.wait (%p43_p1), [#allocation9], 128  }
  0x36   : > { %737 = vsyncadd (%p43_p1), [#allocation9], 4294967168  ;;  %v279_v0 = vld [vmem:[#allocation5 + $0x78] sm:$0xff]  ;;  %v278_v1 = vld [vmem:[#allocation5 + $0x70] sm:$0xff]  ;;  %s478_s23 = sshll.u32 %s812_s22, 3  ;;  %s262_s10 = scalar_lea.vmem [#allocation10], %s472_s5 }
  0x37   : > { %282 = vmatpush.msra.mxu0 %v279_v0  ;;  %v277_v2 = vld [vmem:[#allocation5 + $0x68] sm:$0xff]  ;;  %v276_v3 = vld [vmem:[#allocation5 + $0x60] sm:$0xff]  ;;  %v320_v4 = vld [vmem:[#allocation7 + $0x78] sm:$0xff]  ;;  %s359_s9 = scalar_lea.hbm %s955_s4, %s478_s23  ;;  %s361_s11 = sshll.u32 %s262_s10, 4  ;;  %s362_s11 = int_to_ptr.vmem [resolvable:$true] %s361_s11 }
  0x38   : > { %v275_v5 = vld [vmem:[#allocation5 + $0x58] sm:$0xff]  ;;  %323 = vmatpush.msra.mxu1 %v320_v4  ;;  %v319_v6 = vld [vmem:[#allocation7 + $0x70] sm:$0xff]  ;;  %v318_v7 = vld [vmem:[#allocation7 + $0x68] sm:$0xff]  ;;  %s363_s12 = sshll.u32 %s359_s9, 4  ;;  %s349_s13 = scalar_lea.sflag [#allocation4], %s895_s26  ;;  %s364_s12 = int_to_ptr.hbm [resolvable:$true] %s363_s12 }
  0x39   : > { %283 = vmatpush.msra.mxu0 %v278_v1  ;;  %v274_v8 = vld [vmem:[#allocation5 + $0x50] sm:$0xff]  ;;  %v317_v9 = vld [vmem:[#allocation7 + $0x60] sm:$0xff]  ;;  %v273_v10 = vld [vmem:[#allocation5 + $0x48] sm:$0xff]  ;;  %s696_s22 = sshra.s32 %s364_s12, 4  ;;  %s702_s29 = scalar_lea.hbm %s955_s4, 16  ;;  %s697_s22 = int_to_ptr.hbm [resolvable:$true] %s696_s22 }
  0x3a   : > { %324 = vmatpush.msra.mxu1 %v319_v6  ;;  %v316_v11 = vld [vmem:[#allocation7 + $0x58] sm:$0xff]  ;;  %v272_v12 = vld [vmem:[#allocation5 + $0x40] sm:$0xff]  ;;  %v315_v13 = vld [vmem:[#allocation7 + $0x50] sm:$0xff]  ;;  %s698_s19 = scalar_lea.hbm %s697_s22, 8  ;;  %p703_p12 = scmp.lt.s32.totalorder %s697_s22, %s955_s4 }
  0x3b   : > { %284 = vmatpush.msra.mxu0 %v277_v2  ;;  %v271_v14 = vld [vmem:[#allocation5 + $0x38] sm:$0xff]  ;;  %v314_v15 = vld [vmem:[#allocation7 + $0x48] sm:$0xff]  ;;  %v270_v16 = vld [vmem:[#allocation5 + $0x30] sm:$0xff]  ;;  %p699_p1 = scmp.ne.s32.totalorder %s697_s22, %s698_s19  ;;  %p704_p8 = scmp.lt.s32.totalorder %s702_s29, %s698_s19 }
  0x3c   : > { %325 = vmatpush.msra.mxu1 %v318_v7  ;;  %v313_v17 = vld [vmem:[#allocation7 + $0x40] sm:$0xff]  ;;  %v269_v18 = vld [vmem:[#allocation5 + $0x28] sm:$0xff]  ;;  %v312_v19 = vld [vmem:[#allocation7 + $0x38] sm:$0xff] }
  0x3d   : > { %285 = vmatpush.msra.mxu0 %v276_v3  ;;  %v268_v20 = vld [vmem:[#allocation5 + $0x20] sm:$0xff]  ;;  %v311_v21 = vld [vmem:[#allocation7 + $0x30] sm:$0xff]  ;;  %v267_v22 = vld [vmem:[#allocation5 + $0x18] sm:$0xff]  ;;  %p700_p3 = pnand %p699_p1, %p864_p13  ;;  %p705_p7 = por %p704_p8, %p703_p12 }
  0x3e   : > { %326 = vmatpush.msra.mxu1 %v317_v9  ;;  %v310_v23 = vld [vmem:[#allocation7 + $0x28] sm:$0xff]  ;;  %v266_v24 = vld [vmem:[#allocation5 + $0x10] sm:$0xff]  ;;  %v309_v25 = vld [vmem:[#allocation7 + $0x20] sm:$0xff] }
  0x3f   : > { %286 = vmatpush.msra.mxu0 %v275_v5  ;;  %v265_v26 = vld [vmem:[#allocation5 + $0x8] sm:$0xff]  ;;  %v308_v27 = vld [vmem:[#allocation7 + $0x18] sm:$0xff]  ;;  %v264_v28 = vld [vmem:[#allocation5] sm:$0xff]  ;;  %p701_p5 = pneg %p700_p3 }
  0x40   : > { %327 = vmatpush.msra.mxu1 %v316_v11  ;;  %v263_v29 = vld [vmem:[%s901_s8] sm:$0xff]  ;;  %v306_v31 = vld [vmem:[#allocation7 + $0x8] sm:$0xff]  ;;  %v305_v32 = vld [vmem:[#allocation7] sm:$0xff] }
  0x41   : > { %287 = vmatpush.msra.mxu0 %v274_v8  ;;  %v307_v30 = vld [vmem:[#allocation7 + $0x10] sm:$0xff]  ;;  %v560_v33 = vld [vmem:[#allocation8] ss:$0 sm:$0xff]  ;;  %v561_v38 = vld [vmem:[#allocation8 + $0x1] ss:$0 sm:$0xff]  ;;  %p706_p9 = pnand %p705_p7, %p701_p5 }
  0x42   : > { %328 = vmatpush.msra.mxu1 %v315_v13 }
  0x43   : > { %288 = vmatpush.msra.mxu0 %v273_v10 }
  0x44   : > { %329 = vmatpush.msra.mxu1 %v314_v15 }
  0x45   : > { %289 = vmatpush.msra.mxu0 %v272_v12 }
  0x46   : > { %330 = vmatpush.msra.mxu1 %v313_v17 }
  0x47   : > { %290 = vmatpush.msra.mxu0 %v271_v14 }
  0x48   : > { %331 = vmatpush.msra.mxu1 %v312_v19 }
  0x49   : > { %291 = vmatpush.msra.mxu0 %v270_v16 }
  0x4a   : > { %332 = vmatpush.msra.mxu1 %v311_v21 }
  0x4b   : > { %292 = vmatpush.msra.mxu0 %v269_v18 }
  0x4c   : > { %333 = vmatpush.msra.mxu1 %v310_v23 }
  0x4d   : > { %293 = vmatpush.msra.mxu0 %v268_v20 }
  0x4e   : > { %334 = vmatpush.msra.mxu1 %v309_v25 }
  0x4f   : > { %294 = vmatpush.msra.mxu0 %v267_v22 }
  0x50   : > { %335 = vmatpush.msra.mxu1 %v308_v27 }
  0x51   : > { %295 = vmatpush.msra.mxu0 %v266_v24 }
  0x52   : > { %336 = vmatpush.msra.mxu1 %v307_v30 }
  0x53   : > { %296 = vmatpush.msra.mxu0 %v265_v26 }
  0x54   : > { %337 = vmatpush.msra.mxu1 %v306_v31 }
  0x55   : > { %297 = vmatpush.msra.mxu0 %v264_v28 }
  0x56   : > { %298 = vmatmul.f32.vlgmr.msra.gmra.mxu0 %v263_v29  ;;  %338 = vmatpush.msra.mxu1 %v305_v32 }
  0xd3   : > { %v299_v34 = vpop.f32.mrf.mxu0 }
  0xd4   : > { %v300_v35 = vadd.f32 %v560_v33, %v299_v34 }
  0xd6   : > { %vm302_vm0 = vcmp.gt.f32.partialorder %v300_v35, 0.0  ;;  %v303_v36 = vmul.f32 0.2, %v300_v35 }
  0xd8   : > { %v304_v37 = vsel %vm302_vm0, %v300_v35, %v303_v36 }
  0xd9   : > { %339 = vmatmul.f32.vlgmr.msra.gmra.mxu1 %v304_v37 }
 0x156   : > { %v340_v39 = vpop.f32.mrf.mxu1 }
 0x157   : > { %v341_v40 = vadd.f32 %v561_v38, %v340_v39 }
 0x159   : > { %vm343_vm1 = vcmp.gt.f32.partialorder %v341_v40, 0.0  ;;  %v344_v41 = vmul.f32 0.2, %v341_v40 }
 0x15b   : > { %v345_v42 = vsel %vm343_vm1, %v341_v40, %v344_v41 }
 0x15c   : > { %v346_v43 = vadd.f32 %v345_v42, %v263_v29 }
 0x15e   : > { %347 = vst [vmem:[%s262_s10] sm:$0xff] %v346_v43 }
 0x15f   : > { %709 = shalt.err (!%p706_p9)
}
 0x160   : > { %495 = dma.vmem_to_hbm [thread:$0]  (%p864_p13), %s362_s11, 128, %s364_s12, %s349_s13  }
 0x161 PF: > { %s375_s26 = sand.u32 1, %s744_s15   ;;  %p962_p10 = scmp.ge.s32.totalorder %s756_s18, 2 }
 0x162   : > { %s376_s6 = scalar_lea.sflag [#allocation4], %s375_s26 }
 0x163   : > { %p512_p11 = pnand %p962_p10, %p869_p4 }
 0x165   : > { %p513_p0 = pneg %p512_p11 }
 0x167   : > { %739 = dma.done.wait (%p513_p0), %s376_s6, 128  }
 0x168   : > { %741 = vsyncadd (%p513_p0), %s376_s6, 4294967168  ;;  %p19_p2 = scmp.ge.s32.totalorder %s844_s14, 4   ;;  %s963_s15 = smov %s748_s16 }
 0x169   : > { %s964_s16 = smov %s752_s17  ;;  %s965_s17 = smov %s856_s21 }
 0x16a   : > { %s966_s18 = smov %s844_s14  ;;  %21 = sbr.rel (!%p19_p2) target bundleno = 7 (0x7), region = 93 }
 0x16f   :  { %382 = vsyncpa [#allocation3], 1 }
 0x170   :  { %384 = vsyncpa [#allocation3 + $0x1], 1 }
 0x171   :  { %385 = vsyncpa [#allocation6], 1 }
 0x172   :  { %386 = vsyncpa [#allocation9], 1 }
 0x173   :  { %387 = vsyncpa [#allocation4], 1 }
 0x174   :  { %389 = vsyncpa [#allocation4 + $0x1], 1 }

</bundles_post_ra>
